<compile_context>
chip_gen: v5e
topology: v5e:2x2
jax: 0.10.0
libtpu: 0.0.40
codegen_flags: <defaults>
</compile_context>

<pallas_src>
import functools

import jax
import jax.numpy as jnp
from jax.experimental import pallas as pl
from jax.experimental.pallas import tpu as pltpu


def _mean_pool_kernel(x_ref, o_ref, acc_ref, *, inv_l, last_valid):
    # x_ref:   (bt, tl, th) input tile
    # o_ref:   (bt, th)     output tile (same block across the L grid axis)
    # acc_ref: (bt, th)     f32 VMEM accumulator
    k = pl.program_id(2)
    n_k = pl.num_programs(2)

    @pl.when(k == 0)
    def _init():
        acc_ref[...] = jnp.zeros_like(acc_ref)

    def _tile_sum(mask_tail):
        xv = x_ref[...].astype(jnp.float32)
        if mask_tail:
            # Zero the overhanging rows of the ragged last L tile: reads past
            # the array bound are unspecified and must not reach the sum.
            row = jax.lax.broadcasted_iota(jnp.int32, x_ref.shape, 1)
            xv = jnp.where(row < last_valid, xv, 0.0)
        return jnp.sum(xv, axis=1)

    if last_valid == x_ref.shape[1]:
        # L divides evenly into tiles: no masking needed anywhere.
        acc_ref[...] += _tile_sum(False)
    else:
        @pl.when(k < n_k - 1)
        def _full_step():
            acc_ref[...] += _tile_sum(False)

        @pl.when(k == n_k - 1)
        def _tail_step():
            acc_ref[...] += _tile_sum(True)

    @pl.when(k == n_k - 1)
    def _finalize():
        o_ref[...] = (acc_ref[...] * inv_l).astype(o_ref.dtype)


def _default_tile_bytes() -> int:
    """Generation-aware per-input-buffer byte budget (double-buffered)."""
    try:
        kind = jax.devices()[0].device_kind.lower()
    except Exception:  # pragma: no cover - defensive; perf knob only
        kind = ""
    if "v7" in kind:
        return 16 * 1024 * 1024          # v7x: 3.2 TB/s HBM, 64 MiB VMEM
    if "v5e" in kind or "v5 lite" in kind or "v5lite" in kind:
        return 6 * 1024 * 1024           # v5e: 16 MiB default scoped VMEM
    return 8 * 1024 * 1024               # v6e and others


def mean_pooling(x: jax.Array, *, target_tile_bytes: int | None = None) -> jax.Array:
    """Pallas equivalent of MeanPooling.forward: mean over dim=1 of (B, L, H)."""
    B, L, H = x.shape
    dtype = x.dtype
    itemsize = jnp.dtype(dtype).itemsize
    if target_tile_bytes is None:
        target_tile_bytes = _default_tile_bytes()

    # Dtype-dependent sublane multiple: 8 (f32), 16 (bf16), 32 (int8/fp8).
    m = max(8, 32 // max(itemsize, 1))

    # ---- batch tile ---------------------------------------------------------
    # bt must be a multiple of 8 or equal to B (full-dim blocks are exempt).
    bt = B if B <= 8 else 8

    # ---- hidden tile --------------------------------------------------------
    # Split H only when B gives a single tile, so both v7x TensorCores get work.
    # th must be a multiple of 128 or equal to H.
    if B <= 8 and H >= 256:
        th = pl.cdiv(pl.cdiv(H, 2), 128) * 128
    else:
        th = H
    n_h = pl.cdiv(H, th)

    # ---- sequence tile: fill the per-step byte budget -----------------------
    row_bytes = bt * th * itemsize
    budget_rows = max(1, target_tile_bytes // row_bytes)
    if budget_rows >= L:
        tl = L                                  # full dim: exempt from 8-row rule
    else:
        tl = max(m, (budget_rows // m) * m)
    n_l = pl.cdiv(L, tl)
    last_valid = L - (n_l - 1) * tl             # valid rows in the final L tile

    # ---- whole sequence in one tile: grow bt to cut step count --------------
    if tl == L and B > 8:
        max_bt = max(8, (target_tile_bytes // (L * th * itemsize)) // 8 * 8)
        two_tile_cap = 8 * ((B - 1) // 8)       # largest multiple of 8 below B
        bt = max(8, min(max_bt, two_tile_cap))  # keep >= 2 batch tiles (v7x)
    n_b = pl.cdiv(B, bt)

    grid = (n_b, n_h, n_l)

    # ---- VMEM budget: 2x double-buffered input + output + accumulator -------
    in_tile_bytes = bt * tl * th * itemsize
    out_tile_bytes = bt * th * itemsize
    acc_bytes = bt * th * 4
    vmem_limit = 2 * in_tile_bytes + 2 * out_tile_bytes + acc_bytes + (2 << 20)
    vmem_limit = max(int(vmem_limit), 16 << 20)

    kernel = functools.partial(_mean_pool_kernel,
                               inv_l=1.0 / L, last_valid=last_valid)

    return pl.pallas_call(
        kernel,
        out_shape=jax.ShapeDtypeStruct((B, H), dtype),
        grid_spec=pltpu.PrefetchScalarGridSpec(
            num_scalar_prefetch=0,
            grid=grid,
            in_specs=[pl.BlockSpec((bt, tl, th), lambda b, h, k: (b, k, h))],
            out_specs=pl.BlockSpec((bt, th), lambda b, h, k: (b, h)),
            scratch_shapes=[pltpu.VMEM((bt, th), jnp.float32)],
        ),
        compiler_params=pltpu.CompilerParams(
            dimension_semantics=("parallel", "parallel", "arbitrary"),
            vmem_limit_bytes=vmem_limit,
        ),
    )(x)


if __name__ == "__main__":
    key = jax.random.PRNGKey(0)

    # 1) Small canonical shape (B, L, H) matching the module's usage.
    B, L, H = 2, 8, 32
    x = jax.random.normal(key, (B, L, H), dtype=jnp.float32)
    out = jax.block_until_ready(mean_pooling(x))
    ref = jnp.mean(x, axis=1)
    assert out.shape == (B, H), out.shape
    assert jnp.allclose(out, ref, atol=1e-5, rtol=1e-5), "mismatch (basic)"

    # 2) Ragged B / L / H, single L tile (no padding anywhere, no mask path).
    B2, L2, H2 = 5, 19, 130
    x2 = jax.random.normal(jax.random.PRNGKey(0), (B2, L2, H2), dtype=jnp.float32)
    out2 = jax.block_until_ready(mean_pooling(x2))
    ref2 = jnp.mean(x2, axis=1)
    assert out2.shape == (B2, H2), out2.shape
    assert jnp.allclose(out2, ref2, atol=1e-5, rtol=1e-5), "mismatch (ragged)"

    # 3) Force multiple L tiles with a ragged tail -> exercises the in-kernel mask.
    out3 = jax.block_until_ready(mean_pooling(x2, target_tile_bytes=4096))
    assert jnp.allclose(out3, ref2, atol=1e-5, rtol=1e-5), "mismatch (L-tail mask)"

    # 4) bf16, B > 8 -> 16-row sequence tiles, multiple batch tiles, masked tail.
    B4, L4, H4 = 12, 24, 64
    x4 = jax.random.normal(jax.random.PRNGKey(0), (B4, L4, H4), dtype=jnp.bfloat16)
    out4 = jax.block_until_ready(mean_pooling(x4, target_tile_bytes=8192))
    ref4 = jnp.mean(x4.astype(jnp.float32), axis=1)
    assert out4.shape == (B4, H4), out4.shape
    assert jnp.allclose(out4.astype(jnp.float32), ref4, atol=2e-2), "mismatch (bf16)"

    # 5) Small B with H >= 256 -> H split into two lane-dense parallel tiles
    #    (second tile is a partial edge block).
    B5, L5, H5 = 4, 16, 384
    x5 = jax.random.normal(jax.random.PRNGKey(0), (B5, L5, H5), dtype=jnp.float32)
    out5 = jax.block_until_ready(mean_pooling(x5))
    ref5 = jnp.mean(x5, axis=1)
    assert out5.shape == (B5, H5), out5.shape
    assert jnp.allclose(out5, ref5, atol=1e-5, rtol=1e-5), "mismatch (H split)"

    print("KERNEL_OK")
</pallas_src>

<mosaic_0001>
module attributes {stable_mosaic.version = 11 : i64} {
  func.func @_mean_pool_kernel(%arg0: i32, %arg1: i32, %arg2: i32, %arg3: memref<2x8x32xf32, #tpu.memory_space<vmem>>, %arg4: memref<2x32xf32, #tpu.memory_space<vmem>>, %arg5: memref<2x32xf32, #tpu.memory_space<vmem>>) attributes {dimension_semantics = [#tpu.dimension_semantics<parallel>, #tpu.dimension_semantics<parallel>, #tpu.dimension_semantics<arbitrary>], iteration_bounds = array<i64: 1, 1, 1>, scalar_prefetch = 0 : i64, scratch_operands = 1 : i64, tpu.core_type = #tpu.core_type<tc>, window_params = [{transform_indices = @transform_0, window_bounds = array<i64: 2, 8, 32>}, {transform_indices = @transform_1, window_bounds = array<i64: 2, 32>}]} {
    %c0_i32 = arith.constant 0 : i32
    %0 = arith.cmpi eq, %arg2, %c0_i32 : i32
    %1 = arith.extui %0 : i1 to i32
    %c0_i32_0 = arith.constant 0 : i32
    %2 = arith.cmpi ne, %1, %c0_i32_0 : i32
    scf.if %2 {
      %cst_9 = arith.constant 0.000000e+00 : f32
      %11 = vector.broadcast %cst_9 : f32 to vector<2x32xf32>
      %c0_10 = arith.constant 0 : index
      %c0_11 = arith.constant 0 : index
      %12 = vector.load %arg5[%c0_10, %c0_11] : memref<2x32xf32, #tpu.memory_space<vmem>>, vector<2x32xf32>
      tpu.vector_store %arg5[%c0_10, %c0_11], %11 {strides = array<i32>} : memref<2x32xf32, #tpu.memory_space<vmem>>, vector<2x32xf32>,
    } else {
    }
    %c0 = arith.constant 0 : index
    %c0_1 = arith.constant 0 : index
    %3 = vector.load %arg5[%c0, %c0_1] : memref<2x32xf32, #tpu.memory_space<vmem>>, vector<2x32xf32>
    %c0_2 = arith.constant 0 : index
    %c0_3 = arith.constant 0 : index
    %c0_4 = arith.constant 0 : index
    %4 = vector.load %arg3[%c0_2, %c0_3, %c0_4] : memref<2x8x32xf32, #tpu.memory_space<vmem>>, vector<2x8x32xf32>
    %cst = arith.constant dense<0.000000e+00> : vector<2x32xf32>
    %5 = vector.multi_reduction <add>, %4, %cst [1] : vector<2x8x32xf32> to vector<2x32xf32>
    %6 = arith.addf %3, %5 : vector<2x32xf32>
    %c0_5 = arith.constant 0 : index
    %c0_6 = arith.constant 0 : index
    %7 = vector.load %arg5[%c0_5, %c0_6] : memref<2x32xf32, #tpu.memory_space<vmem>>, vector<2x32xf32>
    tpu.vector_store %arg5[%c0_5, %c0_6], %6 {strides = array<i32>} : memref<2x32xf32, #tpu.memory_space<vmem>>, vector<2x32xf32>,
    %c0_i32_7 = arith.constant 0 : i32
    %8 = arith.cmpi eq, %arg2, %c0_i32_7 : i32
    %9 = arith.extui %8 : i1 to i32
    %c0_i32_8 = arith.constant 0 : i32
    %10 = arith.cmpi ne, %9, %c0_i32_8 : i32
    scf.if %10 {
      %c0_9 = arith.constant 0 : index
      %c0_10 = arith.constant 0 : index
      %11 = vector.load %arg5[%c0_9, %c0_10] : memref<2x32xf32, #tpu.memory_space<vmem>>, vector<2x32xf32>
      %cst_11 = arith.constant 1.250000e-01 : f32
      %12 = vector.broadcast %cst_11 : f32 to vector<2x32xf32>
      %13 = arith.mulf %11, %12 : vector<2x32xf32>
      %c0_12 = arith.constant 0 : index
      %c0_13 = arith.constant 0 : index
      %14 = vector.load %arg4[%c0_12, %c0_13] : memref<2x32xf32, #tpu.memory_space<vmem>>, vector<2x32xf32>
      tpu.vector_store %arg4[%c0_12, %c0_13], %13 {strides = array<i32>} : memref<2x32xf32, #tpu.memory_space<vmem>>, vector<2x32xf32>,
    } else {
    }
    return
  }
  func.func @transform_0(%arg0: i32, %arg1: i32, %arg2: i32) -> (i32, i32, i32) {
    %c0_i32 = arith.constant 0 : i32
    return %arg0, %arg2, %arg1 : i32, i32, i32
  }
  func.func @transform_1(%arg0: i32, %arg1: i32, %arg2: i32) -> (i32, i32) {
    %c0_i32 = arith.constant 0 : i32
    return %arg0, %arg1 : i32, i32
  }
}

</mosaic_0001>

<bundles_post_ra>
// kernel: tpu_custom_call.1
= control target key start
LH: loop header
LB: loop body
LE: loop exit
PB: predicated region body
PF: predicated region fallthrough
CT: control target
= control target key end

     0   :  { %6 = vsyncpa [#allocation4], 0  ;;  %s161_s0 = inlined_call_operand.hbm [shape: f32[2,8,32], index: 0, kind: input, shape index: {}]   ;;  %s162_s1 = inlined_call_operand.hbm [shape: f32[2,32], index: 1, kind: output, shape index: {}]  }
   0x1   :  { %7 = vsyncpa [#allocation5], 0  ;;  %s12_s8 = sshll.u32 %s161_s0, 4  ;;  %s137_s9 = smov [#allocation3]   ;;  %s13_s8 = int_to_ptr.hbm [resolvable:$true] %s12_s8 }
   0x2   :  { %s14_s10 = sshll.u32 %s137_s9, 4  ;;  %s138_s11 = smov 128   ;;  %s15_s10 = int_to_ptr.vmem [resolvable:$true] %s14_s10 }
   0x3   :  { %s139_s12 = smov 8  }
   0x4   :  { %20 = dma.hbm_to_vmem [thread:$0]  %s13_s8, 256, %s15_s10, [#allocation4], %s138_s11, %s138_s11, %s139_s12  }
   0x5   :  { %133 = dma.done.wait [#allocation4], 256  }
   0x6   :  { %134 = vsyncadd [#allocation4], 4294967040  ;;  %vm29_vm0 = vcmask 254976   ;;  %v140_v0 = vmov 0.0   ;;  %vm34_vm1 = vcmask 261120   ;;  %v32_v1 = vld [vmem:[#allocation3] sm:$0xff] }
   0x7   :  { %30 = vst.msk [vmem:[#allocation2] sm:$0x3] %vm29_vm0, %v140_v0  ;;  %v33_v2 = vld [vmem:[#allocation3 + $0x8] sm:$0xff]  ;;  %v35_v3 = vsel %vm34_vm1, %v32_v1, 0.0  ;;  %vm51_vm2 = vcmask 1041409   ;;  %s141_s0 = smov [#allocation6]  }
   0x8   :  { %v42_v4 = vsel %vm34_vm1, %v33_v2, 0.0  ;;  %v36_v5 = vrot.slane %v35_v3, 4  ;;  %s68_s13 = sshll.u32 %s141_s0, 4  ;;  %s70_s16 = sshll.u32 %s162_s1, 4  ;;  %s69_s13 = int_to_ptr.vmem [resolvable:$true] %s68_s13  ;;  %s71_s16 = int_to_ptr.hbm [resolvable:$true] %s70_s16 }
   0x9   :  { %v43_v6 = vrot.slane %v42_v4, 4 }
   0xa   :  { %v37_v7 = vadd.f32 %v36_v5, %v35_v3 }
   0xb   :  { %v44_v8 = vadd.f32 %v43_v6, %v42_v4 }
   0xc   :  { %v38_v9 = vrot.slane %v37_v7, 2 }
   0xd   :  { %v45_v10 = vrot.slane %v44_v8, 2 }
   0xe   :  { %v39_v11 = vadd.f32 %v38_v9, %v37_v7  ;;  %v31_v15 = vld [vmem:[#allocation2] sm:$0x3] }
   0xf   :  { %v46_v12 = vadd.f32 %v45_v10, %v44_v8 }
  0x10   :  { %v40_v13 = vrot.slane %v39_v11, 1 }
  0x11   :  { %v47_v14 = vrot.slane %v46_v12, 1 }
  0x12   :  { %v41_v16 = vadd.f32 %v40_v13, %v39_v11 }
  0x13   :  { %v48_v17 = vadd.f32 %v47_v14, %v46_v12 }
  0x15   :  { %v52_v18 = vsel %vm51_vm2, %v48_v17, %v41_v16 }
  0x16   :  { %v54_v19 = vadd.f32 %v52_v18, %v31_v15 }
  0x18   :  { %56 = vst.msk [vmem:[#allocation2] sm:$0x3] %vm29_vm0, %v54_v19 }
  0x1f   :  { %v60_v20 = vld [vmem:[#allocation2] sm:$0x3] }
  0x20   :  { %v61_v21 = vmul.f32 0.125, %v60_v20 }
  0x22   :  { %62 = vst.msk [vmem:[#allocation6] sm:$0x3] %vm29_vm0, %v61_v21 }
  0x23   :  { %73 = dma.vmem_to_hbm [thread:$0]  %s69_s13, 32, %s71_s16, [#allocation5]  }
  0x24   :  { %135 = dma.done.wait [#allocation5], 32  }
  0x25   :  { %136 = vsyncadd [#allocation5], 4294967264 }
  0x26   :  { %78 = vsyncpa [#allocation4], 1 }
  0x27   :  { %79 = vsyncpa [#allocation5], 1 }

</bundles_post_ra>
